<compile_context>
chip_gen: v5e
topology: v5e:2x2
jax: 0.10.0
libtpu: 0.0.40
codegen_flags: <defaults>
</compile_context>

<pallas_src>
import jax
import jax.numpy as jnp
from jax.experimental import pallas as pl
from jax.experimental.pallas import tpu as pltpu

EPS = 1e-5
LANE = 128


def _bn_relu(h, gamma, beta):
    # Training-mode BatchNorm1d with single-pass stats (f32 throughout).
    # Padded feature columns are identically zero (weights/gamma/beta padded
    # with 0), so they stay zero through normalize + ReLU.
    inv_n = 1.0 / h.shape[0]
    mean = jnp.sum(h, axis=0, keepdims=True) * inv_n
    ex2 = jnp.sum(h * h, axis=0, keepdims=True) * inv_n
    var = jnp.maximum(ex2 - mean * mean, 0.0)          # clamp: no NaN from rsqrt
    scale = jax.lax.rsqrt(var + EPS) * gamma           # rsqrt -> EUP slot
    return jnp.maximum((h - mean) * scale + beta, 0.0)


def net_kernel(x_ref, w1_ref, w23_ref, p_ref, o_ref):
    # x_ref:   (B, in_dim) f32, unpadded
    # w1_ref:  (in_dim, D) bf16 (output dim padded to D)
    # w23_ref: (2, D, D)   bf16 stacked [w2, w3], zero-padded
    # p_ref:   (8, D)      f32 rows [g1, be1, g2, be2, b3, 0, 0, 0]
    # o_ref:   (B, D)      f32 lane-dense padded output
    x = x_ref[...]

    # Layer 1: Linear (bias dropped — absorbed exactly by training-mode BN).
    h = jnp.dot(x.astype(jnp.bfloat16), w1_ref[...],
                preferred_element_type=jnp.float32)
    h = _bn_relu(h, p_ref[0:1, :], p_ref[1:2, :])

    # Layer 2: Linear (bias dropped) -> BN -> ReLU.
    h = jnp.dot(h.astype(jnp.bfloat16), w23_ref[0],
                preferred_element_type=jnp.float32)
    h = _bn_relu(h, p_ref[2:3, :], p_ref[3:4, :])

    # Layer 3: Linear with bias (no BN after it, so the bias stays).
    o_ref[...] = (jnp.dot(h.astype(jnp.bfloat16), w23_ref[1],
                          preferred_element_type=jnp.float32)
                  + p_ref[4:5, :]).astype(o_ref.dtype)


def _pad2(a, rows, cols):
    return jnp.pad(a, ((0, rows - a.shape[0]), (0, cols - a.shape[1])))


def pack_params(params, weight_dtype=jnp.bfloat16):
    """Pad feature dims to a lane-dense D and pack params into 3 operands.

    Call ONCE and reuse across forward calls.  b1/b2 are intentionally
    dropped: Linear bias directly followed by training-mode BatchNorm is a
    no-op (exact).  Would need revisiting for eval-mode BN (running stats).
    """
    in_dim, h1 = params["w1"].shape
    h2 = params["w2"].shape[1]
    out_dim = params["w3"].shape[1]
    D = max(int(pl.cdiv(d, LANE)) * LANE for d in (h1, h2, out_dim))

    # w1: keep true in_dim rows (x is NOT padded per call), pad output dim.
    w1_p = jnp.pad(params["w1"], ((0, 0), (0, D - h1))).astype(weight_dtype)
    w23_p = jnp.stack([
        _pad2(params["w2"], D, D),
        _pad2(params["w3"], D, D),
    ]).astype(weight_dtype)
    p_packed = jnp.concatenate([
        _pad2(params["g1"], 1, D), _pad2(params["be1"], 1, D),
        _pad2(params["g2"], 1, D), _pad2(params["be2"], 1, D),
        _pad2(params["b3"], 1, D),
        jnp.zeros((3, D), jnp.float32),
    ], axis=0)
    return w1_p, w23_p, p_packed, D, out_dim


def net_forward(x, w1_p, w23_p, p_packed, out_dim):
    """x: (B, in_dim) f32. Packed operands come from pack_params (reusable)."""
    B, in_dim = x.shape
    D = w23_p.shape[-1]

    bytes_in = (x.size * x.dtype.itemsize
                + w1_p.size * w1_p.dtype.itemsize
                + w23_p.size * w23_p.dtype.itemsize
                + p_packed.size * p_packed.dtype.itemsize)
    bytes_out = B * D * 4
    flops = 2 * B * D * (in_dim + 2 * D)
    # Single-block footprint: inputs+output (double-buffered by the runtime)
    # plus f32 intermediates; this is the documented B ceiling knob
    # (v7x has only 64 MiB physical VMEM vs 128 MiB on v5e/v6e).
    vmem_need = 2 * (bytes_in + bytes_out) + 6 * B * D * 4 + (1 << 20)
    vmem_limit = int(min(max(vmem_need, 4 << 20), 64 << 20))

    out = pl.pallas_call(
        net_kernel,
        out_shape=jax.ShapeDtypeStruct((B, D), jnp.float32),
        in_specs=[pl.BlockSpec(memory_space=pltpu.MemorySpace.VMEM)] * 4,
        out_specs=pl.BlockSpec(memory_space=pltpu.MemorySpace.VMEM),
        compiler_params=pltpu.CompilerParams(vmem_limit_bytes=vmem_limit),
        cost_estimate=pl.CostEstimate(
            flops=flops, transcendentals=2 * D,
            bytes_accessed=bytes_in + bytes_out),
    )(x, w1_p, w23_p, p_packed)
    # Lane-dense padded store in-kernel; slice the true out_dim here (cheap at
    # small B; at large B, return the padded slab and let the consumer fuse).
    return out[:, :out_dim]


def init_params(key, in_dim, h1, h2, out_dim):
    ks = jax.random.split(key, 3)

    def lin(k, fan_in, fan_out):
        bound = 1.0 / jnp.sqrt(fan_in)
        kw, kb = jax.random.split(k)
        w = jax.random.uniform(kw, (fan_in, fan_out), jnp.float32, -bound, bound)
        b = jax.random.uniform(kb, (1, fan_out), jnp.float32, -bound, bound)
        return w, b

    w1, b1 = lin(ks[0], in_dim, h1)
    w2, b2 = lin(ks[1], h1, h2)
    w3, b3 = lin(ks[2], h2, out_dim)
    return {
        "w1": w1, "b1": b1,
        "g1": jnp.ones((1, h1), jnp.float32), "be1": jnp.zeros((1, h1), jnp.float32),
        "w2": w2, "b2": b2,
        "g2": jnp.ones((1, h2), jnp.float32), "be2": jnp.zeros((1, h2), jnp.float32),
        "w3": w3, "b3": b3,
    }


def net_reference(x, p):
    # Pure-f32 reference matching the PyTorch forward (training-mode BN).
    def bn_relu(h, g, b):
        m = jnp.mean(h, axis=0, keepdims=True)
        v = jnp.mean((h - m) ** 2, axis=0, keepdims=True)
        return jnp.maximum((h - m) / jnp.sqrt(v + EPS) * g + b, 0.0)
    h = bn_relu(x @ p["w1"] + p["b1"], p["g1"], p["be1"])
    h = bn_relu(h @ p["w2"] + p["b2"], p["g2"], p["be2"])
    return h @ p["w3"] + p["b3"]


if __name__ == "__main__":
    key = jax.random.PRNGKey(0)
    kx, kp = jax.random.split(key)

    B, in_dim, h1, h2, out_dim = 8, 32, 64, 64, 16
    x = jax.random.normal(kx, (B, in_dim), jnp.float32)
    params = init_params(kp, in_dim, h1, h2, out_dim)

    # Pack/pad weights once (bf16 for the MXU path); reuse across calls.
    w1_p, w23_p, p_packed, D, out_dim = pack_params(params)

    out = net_forward(x, w1_p, w23_p, p_packed, out_dim)
    out = jax.block_until_ready(out)

    ref = net_reference(x, params)
    assert out.shape == (B, out_dim)
    # bf16 matmul operands => ~1e-2-level deviation from the pure-f32
    # reference (BN elementwise math stays f32); tolerance relaxed accordingly.
    assert jnp.allclose(out, ref, atol=5e-2, rtol=5e-2), \
        float(jnp.max(jnp.abs(out - ref)))

    print("KERNEL_OK")
</pallas_src>

<mosaic_0001>
module attributes {stable_mosaic.version = 11 : i64} {
  func.func @net_kernel(%arg0: memref<8x32xf32, #tpu.memory_space<vmem>>, %arg1: memref<32x128xbf16, #tpu.memory_space<vmem>>, %arg2: memref<2x128x128xbf16, #tpu.memory_space<vmem>>, %arg3: memref<8x128xf32, #tpu.memory_space<vmem>>, %arg4: memref<8x128xf32, #tpu.memory_space<vmem>>) attributes {dimension_semantics = [], scalar_prefetch = 0 : i64, scratch_operands = 0 : i64, tpu.core_type = #tpu.core_type<tc>} {
    %c0 = arith.constant 0 : index
    %c0_0 = arith.constant 0 : index
    %0 = vector.load %arg0[%c0, %c0_0] : memref<8x32xf32, #tpu.memory_space<vmem>>, vector<8x32xf32>
    %1 = arith.truncf %0 : vector<8x32xf32> to vector<8x32xbf16>
    %c0_1 = arith.constant 0 : index
    %c0_2 = arith.constant 0 : index
    %2 = vector.load %arg1[%c0_1, %c0_2] : memref<32x128xbf16, #tpu.memory_space<vmem>>, vector<32x128xbf16>
    %cst = arith.constant dense<0.000000e+00> : vector<8x128xf32>
    %3 = tpu.matmul %1, %2, %cst {dimension_numbers = #tpu.dot_dimension_numbers<[1], [0], [0], [1], [0, 0, 1, 1], [], []>} : vector<8x32xbf16>, vector<32x128xbf16>, vector<8x128xf32> -> vector<8x128xf32>
    %c0_3 = arith.constant 0 : index
    %c0_4 = arith.constant 0 : index
    %4 = vector.load %arg3[%c0_3, %c0_4] : memref<8x128xf32, #tpu.memory_space<vmem>>, vector<1x128xf32>
    %c1 = arith.constant 1 : index
    %c0_5 = arith.constant 0 : index
    %5 = vector.load %arg3[%c1, %c0_5] : memref<8x128xf32, #tpu.memory_space<vmem>>, vector<1x128xf32>
    %cst_6 = arith.constant dense<0.000000e+00> : vector<128xf32>
    %6 = vector.multi_reduction <add>, %3, %cst_6 [0] : vector<8x128xf32> to vector<128xf32>
    %7 = vector.shape_cast %6 : vector<128xf32> to vector<1x128xf32>
    %cst_7 = arith.constant 1.250000e-01 : f32
    %8 = vector.broadcast %cst_7 : f32 to vector<1x128xf32>
    %9 = arith.mulf %7, %8 : vector<1x128xf32>
    %10 = arith.mulf %3, %3 : vector<8x128xf32>
    %cst_8 = arith.constant dense<0.000000e+00> : vector<128xf32>
    %11 = vector.multi_reduction <add>, %10, %cst_8 [0] : vector<8x128xf32> to vector<128xf32>
    %12 = vector.shape_cast %11 : vector<128xf32> to vector<1x128xf32>
    %cst_9 = arith.constant 1.250000e-01 : f32
    %13 = vector.broadcast %cst_9 : f32 to vector<1x128xf32>
    %14 = arith.mulf %12, %13 : vector<1x128xf32>
    %15 = arith.mulf %9, %9 : vector<1x128xf32>
    %16 = arith.subf %14, %15 : vector<1x128xf32>
    %cst_10 = arith.constant 0.000000e+00 : f32
    %17 = vector.broadcast %cst_10 : f32 to vector<1x128xf32>
    %18 = arith.maximumf %16, %17 : vector<1x128xf32>
    %cst_11 = arith.constant 9.99999974E-6 : f32
    %19 = vector.broadcast %cst_11 : f32 to vector<1x128xf32>
    %20 = arith.addf %18, %19 : vector<1x128xf32>
    %21 = math.rsqrt %20 : vector<1x128xf32>
    %22 = arith.mulf %21, %4 : vector<1x128xf32>
    %23 = vector.broadcast %9 : vector<1x128xf32> to vector<8x128xf32>
    %24 = arith.subf %3, %23 : vector<8x128xf32>
    %25 = vector.broadcast %22 : vector<1x128xf32> to vector<8x128xf32>
    %26 = arith.mulf %24, %25 : vector<8x128xf32>
    %27 = vector.broadcast %5 : vector<1x128xf32> to vector<8x128xf32>
    %28 = arith.addf %26, %27 : vector<8x128xf32>
    %cst_12 = arith.constant 0.000000e+00 : f32
    %29 = vector.broadcast %cst_12 : f32 to vector<8x128xf32>
    %30 = arith.maximumf %28, %29 : vector<8x128xf32>
    %31 = arith.truncf %30 : vector<8x128xf32> to vector<8x128xbf16>
    %c0_13 = arith.constant 0 : index
    %c0_14 = arith.constant 0 : index
    %c0_15 = arith.constant 0 : index
    %32 = vector.load %arg2[%c0_13, %c0_14, %c0_15] : memref<2x128x128xbf16, #tpu.memory_space<vmem>>, vector<1x128x128xbf16>
    %33 = vector.shape_cast %32 : vector<1x128x128xbf16> to vector<128x128xbf16>
    %cst_16 = arith.constant dense<0.000000e+00> : vector<8x128xf32>
    %34 = tpu.matmul %31, %33, %cst_16 {dimension_numbers = #tpu.dot_dimension_numbers<[1], [0], [0], [1], [0, 0, 1, 1], [], []>} : vector<8x128xbf16>, vector<128x128xbf16>, vector<8x128xf32> -> vector<8x128xf32>
    %c2 = arith.constant 2 : index
    %c0_17 = arith.constant 0 : index
    %35 = vector.load %arg3[%c2, %c0_17] : memref<8x128xf32, #tpu.memory_space<vmem>>, vector<1x128xf32>
    %c3 = arith.constant 3 : index
    %c0_18 = arith.constant 0 : index
    %36 = vector.load %arg3[%c3, %c0_18] : memref<8x128xf32, #tpu.memory_space<vmem>>, vector<1x128xf32>
    %cst_19 = arith.constant dense<0.000000e+00> : vector<128xf32>
    %37 = vector.multi_reduction <add>, %34, %cst_19 [0] : vector<8x128xf32> to vector<128xf32>
    %38 = vector.shape_cast %37 : vector<128xf32> to vector<1x128xf32>
    %cst_20 = arith.constant 1.250000e-01 : f32
    %39 = vector.broadcast %cst_20 : f32 to vector<1x128xf32>
    %40 = arith.mulf %38, %39 : vector<1x128xf32>
    %41 = arith.mulf %34, %34 : vector<8x128xf32>
    %cst_21 = arith.constant dense<0.000000e+00> : vector<128xf32>
    %42 = vector.multi_reduction <add>, %41, %cst_21 [0] : vector<8x128xf32> to vector<128xf32>
    %43 = vector.shape_cast %42 : vector<128xf32> to vector<1x128xf32>
    %cst_22 = arith.constant 1.250000e-01 : f32
    %44 = vector.broadcast %cst_22 : f32 to vector<1x128xf32>
    %45 = arith.mulf %43, %44 : vector<1x128xf32>
    %46 = arith.mulf %40, %40 : vector<1x128xf32>
    %47 = arith.subf %45, %46 : vector<1x128xf32>
    %cst_23 = arith.constant 0.000000e+00 : f32
    %48 = vector.broadcast %cst_23 : f32 to vector<1x128xf32>
    %49 = arith.maximumf %47, %48 : vector<1x128xf32>
    %cst_24 = arith.constant 9.99999974E-6 : f32
    %50 = vector.broadcast %cst_24 : f32 to vector<1x128xf32>
    %51 = arith.addf %49, %50 : vector<1x128xf32>
    %52 = math.rsqrt %51 : vector<1x128xf32>
    %53 = arith.mulf %52, %35 : vector<1x128xf32>
    %54 = vector.broadcast %40 : vector<1x128xf32> to vector<8x128xf32>
    %55 = arith.subf %34, %54 : vector<8x128xf32>
    %56 = vector.broadcast %53 : vector<1x128xf32> to vector<8x128xf32>
    %57 = arith.mulf %55, %56 : vector<8x128xf32>
    %58 = vector.broadcast %36 : vector<1x128xf32> to vector<8x128xf32>
    %59 = arith.addf %57, %58 : vector<8x128xf32>
    %cst_25 = arith.constant 0.000000e+00 : f32
    %60 = vector.broadcast %cst_25 : f32 to vector<8x128xf32>
    %61 = arith.maximumf %59, %60 : vector<8x128xf32>
    %62 = arith.truncf %61 : vector<8x128xf32> to vector<8x128xbf16>
    %c1_26 = arith.constant 1 : index
    %c0_27 = arith.constant 0 : index
    %c0_28 = arith.constant 0 : index
    %63 = vector.load %arg2[%c1_26, %c0_27, %c0_28] : memref<2x128x128xbf16, #tpu.memory_space<vmem>>, vector<1x128x128xbf16>
    %64 = vector.shape_cast %63 : vector<1x128x128xbf16> to vector<128x128xbf16>
    %cst_29 = arith.constant dense<0.000000e+00> : vector<8x128xf32>
    %65 = tpu.matmul %62, %64, %cst_29 {dimension_numbers = #tpu.dot_dimension_numbers<[1], [0], [0], [1], [0, 0, 1, 1], [], []>} : vector<8x128xbf16>, vector<128x128xbf16>, vector<8x128xf32> -> vector<8x128xf32>
    %c4 = arith.constant 4 : index
    %c0_30 = arith.constant 0 : index
    %66 = vector.load %arg3[%c4, %c0_30] : memref<8x128xf32, #tpu.memory_space<vmem>>, vector<1x128xf32>
    %67 = vector.broadcast %66 : vector<1x128xf32> to vector<8x128xf32>
    %68 = arith.addf %65, %67 : vector<8x128xf32>
    %c0_31 = arith.constant 0 : index
    %c0_32 = arith.constant 0 : index
    %69 = vector.load %arg4[%c0_31, %c0_32] : memref<8x128xf32, #tpu.memory_space<vmem>>, vector<8x128xf32>
    tpu.vector_store %arg4[%c0_31, %c0_32], %68 {strides = array<i32>} : memref<8x128xf32, #tpu.memory_space<vmem>>, vector<8x128xf32>,
    return
  }
}

</mosaic_0001>

<bundles_post_ra>
// kernel: tpu_custom_call.1
= control target key start
LH: loop header
LB: loop body
LE: loop exit
PB: predicated region body
PF: predicated region fallthrough
CT: control target
= control target key end

     0   :  { %9 = vsyncpa [#allocation3], 0  ;;  %s648_s0 = inlined_call_operand.hbm [shape: f32[8,32], index: 0, kind: input, shape index: {}]   ;;  %s649_s1 = inlined_call_operand.hbm [shape: bf16[32,128], index: 1, kind: input, shape index: {}]   ;;  %s650_s2 = inlined_call_operand.hbm [shape: bf16[2,128,128], index: 2, kind: input, shape index: {}]   ;;  %s651_s3 = inlined_call_operand.hbm [shape: f32[8,128], index: 3, kind: input, shape index: {}]   ;;  %s652_s4 = inlined_call_operand.hbm [shape: f32[8,128], index: 4, kind: output, shape index: {}]  }
   0x1   :  { %10 = vsyncpa [#allocation6], 0 }
   0x2   :  { %11 = vsyncpa [#allocation9], 0  ;;  %s28_s17 = sshll.u32 %s649_s1, 4  ;;  %s29_s17 = int_to_ptr.hbm [resolvable:$true] %s28_s17 }
   0x3   :  { %12 = vsyncpa [#allocation4], 0  ;;  %s601_s18 = smov [#allocation5]   ;;  %s18_s22 = sshll.u32 %s648_s0, 4  ;;  %s19_s22 = int_to_ptr.hbm [resolvable:$true] %s18_s22 }
   0x4   :  { %s30_s19 = sshll.u32 %s601_s18, 4  ;;  %s602_s23 = smov 64   ;;  %s31_s19 = int_to_ptr.vmem [resolvable:$true] %s30_s19 }
   0x5   :  { %s603_s24 = smov 4   ;;  %s604_s25 = smov [#allocation2]  }
   0x6   :  { %36 = dma.hbm_to_vmem [thread:$0]  %s29_s17, 256, %s31_s19, [#allocation6], %s602_s23, %s602_s23, %s603_s24  }
   0x7   :  { %s20_s26 = sshll.u32 %s604_s25, 4  ;;  %s41_s29 = sshll.u32 %s650_s2, 4  ;;  %s21_s26 = int_to_ptr.vmem [resolvable:$true] %s20_s26  ;;  %s42_s29 = int_to_ptr.hbm [resolvable:$true] %s41_s29 }
   0x8   :  { %23 = dma.hbm_to_vmem [thread:$0]  %s19_s22, 128, %s21_s26, [#allocation3]  }
   0x9   :  { %s55_s5 = sshll.u32 %s651_s3, 4  ;;  %s605_s6 = smov [#allocation7]   ;;  %s56_s5 = int_to_ptr.hbm [resolvable:$true] %s55_s5 }
   0xa   :  { %s43_s7 = sshll.u32 %s605_s6, 4  ;;  %s606_s0 = smov [#allocation8]   ;;  %s44_s7 = int_to_ptr.vmem [resolvable:$true] %s43_s7 }
   0xb   :  { %49 = dma.hbm_to_vmem [thread:$0]  %s42_s29, 2048, %s44_s7, [#allocation6], %s602_s23, %s602_s23, %s603_s24  }
   0xc   :  { %s57_s8 = sshll.u32 %s606_s0, 4  ;;  %s58_s8 = int_to_ptr.vmem [resolvable:$true] %s57_s8 }
   0xd   :  { %60 = dma.hbm_to_vmem [thread:$0]  %s56_s5, 128, %s58_s8, [#allocation9]  }
   0xe   :  { %593 = dma.done.wait [#allocation3], 128  }
   0xf   :  { %594 = vsyncadd [#allocation3], 4294967168 }
  0x10   :  { %595 = dma.done.wait [#allocation6], 2304  }
  0x11   :  { %596 = vsyncadd [#allocation6], 4294964992 }
  0x12   :  { %597 = dma.done.wait [#allocation9], 128  }
  0x13   :  { %598 = vsyncadd [#allocation9], 4294967168  ;;  %v442_v0 = vld [vmem:[#allocation5 + $0x8] sm:$0xff]  ;;  %v441_v1 = vld [vmem:[#allocation5] sm:$0xff]  ;;  %vm96_vm0 = vcmask 261120   ;;  %s607_s2 = smov [#allocation10]  }
  0x14   :  { %106 = vmatpush.bf16.msra.mxu0 %v442_v0  ;;  %v78_v2 = vld [vmem:[#allocation2] sm:$0xff]  ;;  %v450_v4 = vld [vmem:[#allocation7 + $0x38] sm:$0xff]  ;;  %v449_v5 = vld [vmem:[#allocation7 + $0x30] sm:$0xff]  ;;  %s354_s3 = sshll.u32 %s607_s2, 4  ;;  %s356_s11 = sshll.u32 %s652_s4, 4  ;;  %s355_s3 = int_to_ptr.vmem [resolvable:$true] %s354_s3  ;;  %s357_s11 = int_to_ptr.hbm [resolvable:$true] %s356_s11 }
  0x15   :  { %v79_v3 = vpack.c.bf16 %v78_v2, %v78_v2  ;;  %216 = vmatpush.bf16.msra.mxu1 %v450_v4  ;;  %v448_v6 = vld [vmem:[#allocation7 + $0x28] sm:$0xff]  ;;  %v447_v7 = vld [vmem:[#allocation7 + $0x20] sm:$0xff]  ;;  %v446_v11 = vld [vmem:[#allocation7 + $0x18] sm:$0xff] }
  0x16   :  { %v445_v16 = vld [vmem:[#allocation7 + $0x10] sm:$0xff]  ;;  %v444_v22 = vld [vmem:[#allocation7 + $0x8] sm:$0xff]  ;;  %v443_v27 = vld [vmem:[#allocation7] sm:$0xff] }
  0x17   :  { %v113_v38 = vld [vmem:[#allocation8] sm:$0x1]  ;;  %v466_v44 = vld [vmem:[#allocation8 + $0x1] ss:$0 sm:$0xff]  ;;  %v458_v49 = vld [vmem:[#allocation7 + $0x78] sm:$0xff] }
  0x18   :  { %107 = vmatpush.bf16.msra.mxu0 %v441_v1  ;;  %335 = vmatpush.bf16.msra.mxu2 %v458_v49  ;;  %v457_v50 = vld [vmem:[#allocation7 + $0x70] sm:$0xff]  ;;  %v456_v51 = vld [vmem:[#allocation7 + $0x68] sm:$0xff]  ;;  %v455_v52 = vld [vmem:[#allocation7 + $0x60] sm:$0xff] }
  0x19   :  { %217 = vmatpush.bf16.msra.mxu1 %v449_v5  ;;  %v454_v56 = vld [vmem:[#allocation7 + $0x58] sm:$0xff]  ;;  %v453_v61 = vld [vmem:[#allocation7 + $0x50] sm:$0xff] }
  0x1b   :  { %376 = vmatmul.msk.bf16.vlgmr.msra.gmra.mxu0 %vm96_vm0, %v79_v3  ;;  %v452_v3 = vld [vmem:[#allocation7 + $0x48] sm:$0xff] }
  0x1c   :  { %336 = vmatpush.bf16.msra.mxu2 %v457_v50 }
  0x1d   :  { %218 = vmatpush.bf16.msra.mxu1 %v448_v6 }
  0x20   :  { %337 = vmatpush.bf16.msra.mxu2 %v456_v51 }
  0x21   :  { %219 = vmatpush.bf16.msra.mxu1 %v447_v7 }
  0x24   :  { %338 = vmatpush.bf16.msra.mxu2 %v455_v52 }
  0x25   :  { %220 = vmatpush.bf16.msra.mxu1 %v446_v11 }
  0x28   :  { %339 = vmatpush.bf16.msra.mxu2 %v454_v56 }
  0x29   :  { %221 = vmatpush.bf16.msra.mxu1 %v445_v16 }
  0x2c   :  { %340 = vmatpush.bf16.msra.mxu2 %v453_v61 }
  0x2d   :  { %222 = vmatpush.bf16.msra.mxu1 %v444_v22 }
  0x30   :  { %341 = vmatpush.bf16.msra.mxu2 %v452_v3 }
  0x31   :  { %223 = vmatpush.bf16.msra.mxu1 %v443_v27 }
  0x98   :  { %v109_v8 = vpop.f32.mrf.mxu0 }
  0x99   :  { %v115_v9 = vrot.slane %v109_v8, 4  ;;  %v122_v10 = vmul.f32 %v109_v8, %v109_v8 }
  0x9b   :  { %v116_v12 = vadd.f32 %v115_v9, %v109_v8  ;;  %v123_v13 = vrot.slane %v122_v10, 4 }
  0x9d   :  { %v117_v14 = vrot.slane %v116_v12, 2  ;;  %v124_v15 = vadd.f32 %v123_v13, %v122_v10 }
  0x9f   :  { %v118_v17 = vadd.f32 %v117_v14, %v116_v12  ;;  %v125_v18 = vrot.slane %v124_v15, 2 }
  0xa0   :  { %v111_v19 = vpop.f32.mrf.mxu0 }
  0xa1   :  { %v119_v20 = vrot.slane %v118_v17, 1  ;;  %v126_v21 = vadd.f32 %v125_v18, %v124_v15  ;;  %v229_v19 = vld [vmem:[#allocation8 + $0x2] sm:$0x1] }
  0xa3   :  { %v120_v23 = vadd.f32 %v119_v20, %v118_v17  ;;  %v127_v24 = vrot.slane %v126_v21, 1 }
  0xa5   :  { %v121_v25 = vmul.f32 0.125, %v120_v23  ;;  %v128_v26 = vadd.f32 %v127_v24, %v126_v21 }
  0xa7   :  { %v129_v28 = vmul.f32 0.125, %v128_v26  ;;  %v130_v29 = vmul.f32 %v121_v25, %v121_v25  ;;  %v145_v42 = vsub.f32 %v109_v8, %v121_v25  ;;  %v451_v8 = vld [vmem:[#allocation7 + $0x40] sm:$0xff] }
  0xa8   :  { %342 = vmatpush.bf16.msra.mxu2 %v451_v8  ;;  %v467_v25 = vld [vmem:[#allocation8 + $0x3] ss:$0 sm:$0xff] }
  0xa9   :  { %v131_v30 = vsub.f32 %v129_v28, %v130_v29 }
  0xab   :  { %v132_v31 = vmax.f32 %v131_v30, 0.0  ;;  %v468_v30 = vld [vmem:[#allocation8 + $0x4] ss:$0 sm:$0xff] }
  0xad   :  { %v133_v32 = vadd.f32 1e-05, %v132_v31 }
  0xaf   :  { %469 = vrsqrt.f32 %v133_v32  ;;  %vm140_vm2 = vweird.f32 %v133_v32 }
  0xb5   :  { %v470_v33 = vpop.eup %469 }
  0xb6   :  { %v135_v34 = vmul.f32 %v470_v33, %v133_v32  ;;  %vm141_vm1 = vweird.f32 %v470_v33 }
  0xb7   :  { %vm142_vm3 = vmor %vm140_vm2, %vm141_vm1 }
  0xb8   :  { %v136_v35 = vmul.f32 %v470_v33, %v135_v34 }
  0xba   :  { %v137_v36 = vmul.f32 0.5, %v136_v35 }
  0xbc   :  { %v138_v37 = vsub.f32 1.5, %v137_v36 }
  0xbe   :  { %v139_v39 = vmul.f32 %v470_v33, %v138_v37 }
  0xc0   :  { %v143_v40 = vsel %vm142_vm3, %v470_v33, %v139_v39 }
  0xc1   :  { %v144_v41 = vmul.f32 %v143_v40, %v113_v38 }
  0xc3   :  { %v146_v43 = vperm.slane %v144_v41, 0 }
  0xc5   :  { %v147_v45 = vmul.f32 %v146_v43, %v145_v42 }
  0xc7   :  { %v149_v46 = vadd.f32 %v466_v44, %v147_v45 }
  0xc9   :  { %v150_v47 = vmax.f32 %v149_v46, 0.0 }
  0xcb   :  { %v151_v48 = vpack.c.bf16 %v150_v47, %v150_v47 }
  0xcd   :  { %224 = vmatmul.bf16.vlgmr.msra.gmra.mxu1 %v151_v48 }
 0x14a   :  { %v225_v53 = vpop.f32.mrf.mxu1 }
 0x14b   :  { %v231_v54 = vrot.slane %v225_v53, 4  ;;  %v238_v55 = vmul.f32 %v225_v53, %v225_v53 }
 0x14d   :  { %v232_v57 = vadd.f32 %v231_v54, %v225_v53  ;;  %v239_v58 = vrot.slane %v238_v55, 4 }
 0x14f   :  { %v233_v59 = vrot.slane %v232_v57, 2  ;;  %v240_v60 = vadd.f32 %v239_v58, %v238_v55 }
 0x151   :  { %v234_v62 = vadd.f32 %v233_v59, %v232_v57  ;;  %v241_v63 = vrot.slane %v240_v60, 2 }
 0x152   :  { %v227_v0 = vpop.f32.mrf.mxu1 }
 0x153   :  { %v235_v1 = vrot.slane %v234_v62, 1  ;;  %v242_v2 = vadd.f32 %v241_v63, %v240_v60 }
 0x155   :  { %v236_v4 = vadd.f32 %v235_v1, %v234_v62  ;;  %v243_v5 = vrot.slane %v242_v2, 1 }
 0x157   :  { %v237_v6 = vmul.f32 0.125, %v236_v4  ;;  %v244_v7 = vadd.f32 %v243_v5, %v242_v2 }
 0x159   :  { %v245_v9 = vmul.f32 0.125, %v244_v7  ;;  %v246_v10 = vmul.f32 %v237_v6, %v237_v6  ;;  %v261_v23 = vsub.f32 %v225_v53, %v237_v6 }
 0x15b   :  { %v247_v11 = vsub.f32 %v245_v9, %v246_v10 }
 0x15d   :  { %v248_v12 = vmax.f32 %v247_v11, 0.0 }
 0x15f   :  { %v249_v13 = vadd.f32 1e-05, %v248_v12 }
 0x161   :  { %471 = vrsqrt.f32 %v249_v13  ;;  %vm256_vm5 = vweird.f32 %v249_v13 }
 0x167   :  { %v472_v14 = vpop.eup %471 }
 0x168   :  { %v251_v15 = vmul.f32 %v472_v14, %v249_v13  ;;  %vm257_vm4 = vweird.f32 %v472_v14 }
 0x169   :  { %vm258_vm6 = vmor %vm256_vm5, %vm257_vm4 }
 0x16a   :  { %v252_v16 = vmul.f32 %v472_v14, %v251_v15 }
 0x16c   :  { %v253_v17 = vmul.f32 0.5, %v252_v16 }
 0x16e   :  { %v254_v18 = vsub.f32 1.5, %v253_v17 }
 0x170   :  { %v255_v20 = vmul.f32 %v472_v14, %v254_v18 }
 0x172   :  { %v259_v21 = vsel %vm258_vm6, %v472_v14, %v255_v20 }
 0x173   :  { %v260_v22 = vmul.f32 %v259_v21, %v229_v19 }
 0x175   :  { %v262_v24 = vperm.slane %v260_v22, 0 }
 0x177   :  { %v263_v26 = vmul.f32 %v262_v24, %v261_v23 }
 0x179   :  { %v265_v27 = vadd.f32 %v467_v25, %v263_v26 }
 0x17b   :  { %v266_v28 = vmax.f32 %v265_v27, 0.0 }
 0x17d   :  { %v267_v29 = vpack.c.bf16 %v266_v28, %v266_v28 }
 0x17f   :  { %343 = vmatmul.bf16.vlgmr.msra.gmra.mxu2 %v267_v29 }
 0x202   :  { %v344_v31 = vpop.f32.mrf.mxu2 }
 0x203   :  { %v345_v32 = vadd.f32 %v468_v30, %v344_v31 }
 0x205   :  { %348 = vst [vmem:[#allocation10] sm:$0xff] %v345_v32 }
 0x206   :  { %359 = dma.vmem_to_hbm [thread:$0]  %s355_s3, 128, %s357_s11, [#allocation4]  }
 0x20a   :  { %v346_v33 = vpop.f32.mrf.mxu2 }
 0x20b   :  { %599 = dma.done.wait [#allocation4], 128  }
 0x20c   :  { %600 = vsyncadd [#allocation4], 4294967168 }
 0x20d   :  { %364 = vsyncpa [#allocation3], 1 }
 0x20e   :  { %365 = vsyncpa [#allocation6], 1 }
 0x20f   :  { %366 = vsyncpa [#allocation9], 1 }
 0x210   :  { %367 = vsyncpa [#allocation4], 1 }

</bundles_post_ra>
